<compile_context>
chip_gen: v6e
topology: v6e:2x2x1
jax: 0.10.0
libtpu: 0.0.40
codegen_flags: <defaults>
</compile_context>

<pallas_src>
import functools

import jax
import jax.numpy as jnp
from jax.experimental import pallas as pl
from jax.experimental.pallas import tpu as pltpu

IN_DIM = 784
HID_DIM = 256
OUT_DIM = 10
OUT_PAD = 128  # second-layer matmul N padded to 128 lanes (clean MXU path)


def _round_up(x, m):
    return -(-x // m) * m


def _cdiv(a, b):
    return -(-a // b)


def _mlp_kernel(x_ref, w1_ref, b1_ref, w2_ref, b2_ref, o_ref, h_ref):
    """One batch tile: (TB,784)@(784,256)+b1 -> ReLU -> (TB,256)@(256,128)+b2 -> first 10 lanes."""
    # Layer 1: bf16 MXU pass with f32 accumulation, bias + ReLU, hidden kept
    # in an explicit bf16 VMEM scratch (TB, 256).
    x = x_ref[...].astype(jnp.bfloat16)
    h = jnp.dot(x, w1_ref[...], preferred_element_type=jnp.float32)
    h_ref[...] = jnp.maximum(h + b1_ref[...], 0.0).astype(jnp.bfloat16)
    # Layer 2: padded-to-128 matmul + bias; store only the 10 real lanes so
    # the HBM output array is (tb, 10) (no padded writeback, no post-slice).
    out = jnp.dot(h_ref[...], w2_ref[...], preferred_element_type=jnp.float32)
    out = out + b2_ref[...]
    o_ref[...] = out[:, :OUT_DIM].astype(o_ref.dtype)


@functools.partial(jax.jit, static_argnames=("block_b",))
def neural_network_forward(x, w1, b1, w2, b2, *, block_b=2048):
    """Fused MLP forward pass.

    x : (B, 784)  f32 or bf16 (bf16 recommended from the producer)
    w1: (784, 256)           (transposed vs. PyTorch nn.Linear.weight)
    b1: (1, 256)
    w2: (256, 10)
    b2: (1, 10)
    returns (B, 10) f32
    """
    B = x.shape[0]

    # ---- Batch tiling ------------------------------------------------------
    # tb must be a multiple of 8 (sublane); balance tiles so batch padding is
    # minimal, and keep >= 2 tiles when possible so v7x megacore ("parallel"
    # batch axis) uses both TensorCores.
    b_pad8 = _round_up(B, 8)
    nb = max(1, _cdiv(b_pad8, block_b))
    if nb == 1 and b_pad8 >= 16:
        nb = 2
    tb = _round_up(_cdiv(b_pad8, nb), 8)
    nb = _cdiv(b_pad8, tb)
    b_pad = nb * tb

    if b_pad != B:
        x = jnp.pad(x, ((0, b_pad - B), (0, 0)))

    # ---- Weight preparation (one-time, outside the hot loop) ---------------
    w1b = w1.astype(jnp.bfloat16)
    w2p = jnp.pad(w2, ((0, 0), (0, OUT_PAD - OUT_DIM))).astype(jnp.bfloat16)
    b1f = b1.astype(jnp.float32)
    b2p = jnp.pad(b2.astype(jnp.float32), ((0, 0), (0, OUT_PAD - OUT_DIM)))

    # ---- VMEM budget: double-buffered x/out tiles + resident weights + h ---
    x_bytes = x.dtype.itemsize
    vmem_bytes = (
        2 * tb * IN_DIM * x_bytes          # x tiles (double-buffered)
        + 2 * tb * OUT_DIM * 4             # out tiles (double-buffered)
        + 2 * (IN_DIM * HID_DIM) * 2       # W1 (bf16, default 2 buffers)
        + 2 * HID_DIM * 4                  # b1
        + 2 * (HID_DIM * OUT_PAD) * 2      # W2 padded (bf16)
        + 2 * OUT_PAD * 4                  # b2 padded
        + tb * HID_DIM * 2                 # hidden scratch (bf16)
    )
    vmem_limit = min(int(vmem_bytes * 1.4) + (2 << 20), 128 << 20)

    flops = 2 * b_pad * IN_DIM * HID_DIM + 2 * b_pad * HID_DIM * OUT_PAD
    bytes_accessed = (
        b_pad * IN_DIM * x_bytes          # read x
        + b_pad * OUT_DIM * 4             # write out (unpadded)
        + IN_DIM * HID_DIM * 2            # W1 (bf16)
        + HID_DIM * 4                     # b1
        + HID_DIM * OUT_PAD * 2           # W2 (bf16)
        + OUT_PAD * 4                     # b2
    )

    out = pl.pallas_call(
        _mlp_kernel,
        out_shape=jax.ShapeDtypeStruct((b_pad, OUT_DIM), jnp.float32),
        grid_spec=pltpu.PrefetchScalarGridSpec(
            num_scalar_prefetch=0,
            grid=(nb,),
            in_specs=[
                pl.BlockSpec((tb, IN_DIM), lambda i: (i, 0)),           # x tile
                pl.BlockSpec((IN_DIM, HID_DIM), lambda i: (0, 0)),      # W1 resident
                pl.BlockSpec((1, HID_DIM), lambda i: (0, 0)),           # b1 resident
                pl.BlockSpec((HID_DIM, OUT_PAD), lambda i: (0, 0)),     # W2 resident
                pl.BlockSpec((1, OUT_PAD), lambda i: (0, 0)),           # b2 resident
            ],
            out_specs=pl.BlockSpec((tb, OUT_DIM), lambda i: (i, 0)),
            scratch_shapes=[pltpu.VMEM((tb, HID_DIM), jnp.bfloat16)],
        ),
        compiler_params=pltpu.CompilerParams(
            dimension_semantics=("parallel",),   # shard batch tiles across TCs (v7x)
            vmem_limit_bytes=vmem_limit,
        ),
        cost_estimate=pl.CostEstimate(
            flops=flops, bytes_accessed=bytes_accessed, transcendentals=0
        ),
    )(x, w1b, b1f, w2p, b2p)

    if b_pad != B:
        out = out[:B]
    return out


def init_params(key):
    """Deterministic init mimicking nn.Linear default (uniform +/- 1/sqrt(fan_in))."""
    k1, k2, k3, k4 = jax.random.split(key, 4)
    bound1 = 1.0 / jnp.sqrt(float(IN_DIM))
    bound2 = 1.0 / jnp.sqrt(float(HID_DIM))
    # Stored as (in, out) so the kernel does x @ W (PyTorch stores (out, in)).
    w1 = jax.random.uniform(k1, (IN_DIM, HID_DIM), jnp.float32, -bound1, bound1)
    b1 = jax.random.uniform(k2, (1, HID_DIM), jnp.float32, -bound1, bound1)
    w2 = jax.random.uniform(k3, (HID_DIM, OUT_DIM), jnp.float32, -bound2, bound2)
    b2 = jax.random.uniform(k4, (1, OUT_DIM), jnp.float32, -bound2, bound2)
    return w1, b1, w2, b2


def _reference(x, w1, b1, w2, b2):
    """Pure-JAX reference of the same math, with operands rounded to bf16 the
    same way the kernel does (accumulation stays f32)."""
    f32 = jnp.float32
    xb = x.astype(jnp.bfloat16).astype(f32)
    w1b = w1.astype(jnp.bfloat16).astype(f32)
    w2b = w2.astype(jnp.bfloat16).astype(f32)
    h = jnp.maximum(xb @ w1b + b1, 0.0)
    hb = h.astype(jnp.bfloat16).astype(f32)
    return hb @ w2b + b2


if __name__ == "__main__":
    key = jax.random.PRNGKey(0)
    pkey, xkey, x2key = jax.random.split(key, 3)

    w1, b1, w2, b2 = init_params(pkey)

    # Small batch smoke test (single-tile path).
    B = 8
    x = jax.random.normal(xkey, (B, IN_DIM), jnp.float32)
    out = jax.block_until_ready(neural_network_forward(x, w1, b1, w2, b2))
    ref = _reference(x, w1, b1, w2, b2)
    assert out.shape == (B, OUT_DIM), out.shape
    assert jnp.allclose(out, ref, atol=2e-2, rtol=2e-2), float(
        jnp.max(jnp.abs(out - ref))
    )

    # Non-multiple-of-8 batch: exercises padding + multi-tile (>=2 grid steps).
    B2 = 20
    x2 = jax.random.normal(x2key, (B2, IN_DIM), jnp.float32)
    out2 = jax.block_until_ready(neural_network_forward(x2, w1, b1, w2, b2))
    ref2 = _reference(x2, w1, b1, w2, b2)
    assert out2.shape == (B2, OUT_DIM), out2.shape
    assert jnp.allclose(out2, ref2, atol=2e-2, rtol=2e-2), float(
        jnp.max(jnp.abs(out2 - ref2))
    )

    print("KERNEL_OK")
</pallas_src>

<mosaic_0001>
module attributes {stable_mosaic.version = 11 : i64} {
  func.func @_mlp_kernel(%arg0: i32, %arg1: memref<8x784xf32, #tpu.memory_space<vmem>>, %arg2: memref<784x256xbf16, #tpu.memory_space<vmem>>, %arg3: memref<1x256xf32, #tpu.memory_space<vmem>>, %arg4: memref<256x128xbf16, #tpu.memory_space<vmem>>, %arg5: memref<1x128xf32, #tpu.memory_space<vmem>>, %arg6: memref<8x10xf32, #tpu.memory_space<vmem>>, %arg7: memref<8x256xbf16, #tpu.memory_space<vmem>>) attributes {dimension_semantics = [#tpu.dimension_semantics<parallel>], iteration_bounds = array<i64: 1>, scalar_prefetch = 0 : i64, scratch_operands = 1 : i64, tpu.core_type = #tpu.core_type<tc>, window_params = [{transform_indices = @transform_0, window_bounds = array<i64: 8, 784>}, {pipeline_mode = #tpu.pipeline_mode<synchronous>, transform_indices = @transform_1, window_bounds = array<i64: 784, 256>}, {pipeline_mode = #tpu.pipeline_mode<synchronous>, transform_indices = @transform_2, window_bounds = array<i64: 1, 256>}, {pipeline_mode = #tpu.pipeline_mode<synchronous>, transform_indices = @transform_3, window_bounds = array<i64: 256, 128>}, {pipeline_mode = #tpu.pipeline_mode<synchronous>, transform_indices = @transform_4, window_bounds = array<i64: 1, 128>}, {transform_indices = @transform_5, window_bounds = array<i64: 8, 10>}]} {
    %c0 = arith.constant 0 : index
    %c0_0 = arith.constant 0 : index
    %0 = vector.load %arg1[%c0, %c0_0] : memref<8x784xf32, #tpu.memory_space<vmem>>, vector<8x784xf32>
    %1 = arith.truncf %0 : vector<8x784xf32> to vector<8x784xbf16>
    %c0_1 = arith.constant 0 : index
    %c0_2 = arith.constant 0 : index
    %2 = vector.load %arg2[%c0_1, %c0_2] : memref<784x256xbf16, #tpu.memory_space<vmem>>, vector<784x256xbf16>
    %cst = arith.constant dense<0.000000e+00> : vector<8x256xf32>
    %3 = tpu.matmul %1, %2, %cst {dimension_numbers = #tpu.dot_dimension_numbers<[1], [0], [0], [1], [0, 0, 1, 1], [], []>} : vector<8x784xbf16>, vector<784x256xbf16>, vector<8x256xf32> -> vector<8x256xf32>
    %c0_3 = arith.constant 0 : index
    %c0_4 = arith.constant 0 : index
    %4 = vector.load %arg3[%c0_3, %c0_4] : memref<1x256xf32, #tpu.memory_space<vmem>>, vector<1x256xf32>
    %5 = vector.broadcast %4 : vector<1x256xf32> to vector<8x256xf32>
    %6 = arith.addf %3, %5 : vector<8x256xf32>
    %cst_5 = arith.constant 0.000000e+00 : f32
    %7 = vector.broadcast %cst_5 : f32 to vector<8x256xf32>
    %8 = arith.maximumf %6, %7 : vector<8x256xf32>
    %9 = arith.truncf %8 : vector<8x256xf32> to vector<8x256xbf16>
    %c0_6 = arith.constant 0 : index
    %c0_7 = arith.constant 0 : index
    %10 = vector.load %arg7[%c0_6, %c0_7] : memref<8x256xbf16, #tpu.memory_space<vmem>>, vector<8x256xbf16>
    tpu.vector_store %arg7[%c0_6, %c0_7], %9 {strides = array<i32>} : memref<8x256xbf16, #tpu.memory_space<vmem>>, vector<8x256xbf16>,
    %c0_8 = arith.constant 0 : index
    %c0_9 = arith.constant 0 : index
    %11 = vector.load %arg7[%c0_8, %c0_9] : memref<8x256xbf16, #tpu.memory_space<vmem>>, vector<8x256xbf16>
    %c0_10 = arith.constant 0 : index
    %c0_11 = arith.constant 0 : index
    %12 = vector.load %arg4[%c0_10, %c0_11] : memref<256x128xbf16, #tpu.memory_space<vmem>>, vector<256x128xbf16>
    %cst_12 = arith.constant dense<0.000000e+00> : vector<8x128xf32>
    %13 = tpu.matmul %11, %12, %cst_12 {dimension_numbers = #tpu.dot_dimension_numbers<[1], [0], [0], [1], [0, 0, 1, 1], [], []>} : vector<8x256xbf16>, vector<256x128xbf16>, vector<8x128xf32> -> vector<8x128xf32>
    %c0_13 = arith.constant 0 : index
    %c0_14 = arith.constant 0 : index
    %14 = vector.load %arg5[%c0_13, %c0_14] : memref<1x128xf32, #tpu.memory_space<vmem>>, vector<1x128xf32>
    %15 = vector.broadcast %14 : vector<1x128xf32> to vector<8x128xf32>
    %16 = arith.addf %13, %15 : vector<8x128xf32>
    %17 = vector.extract_strided_slice %16 {offsets = [0, 0], sizes = [8, 10], strides = [1, 1]} : vector<8x128xf32> to vector<8x10xf32>
    %c0_15 = arith.constant 0 : index
    %c0_16 = arith.constant 0 : index
    %18 = vector.load %arg6[%c0_15, %c0_16] : memref<8x10xf32, #tpu.memory_space<vmem>>, vector<8x10xf32>
    tpu.vector_store %arg6[%c0_15, %c0_16], %17 {strides = array<i32>} : memref<8x10xf32, #tpu.memory_space<vmem>>, vector<8x10xf32>,
    return
  }
  func.func @transform_0(%arg0: i32) -> (i32, i32) {
    %c0_i32 = arith.constant 0 : i32
    %c0_i32_0 = arith.constant 0 : i32
    return %arg0, %c0_i32 : i32, i32
  }
  func.func @transform_1(%arg0: i32) -> (i32, i32) {
    %c0_i32 = arith.constant 0 : i32
    %c0_i32_0 = arith.constant 0 : i32
    %c0_i32_1 = arith.constant 0 : i32
    return %c0_i32, %c0_i32_0 : i32, i32
  }
  func.func @transform_2(%arg0: i32) -> (i32, i32) {
    %c0_i32 = arith.constant 0 : i32
    %c0_i32_0 = arith.constant 0 : i32
    %c0_i32_1 = arith.constant 0 : i32
    return %c0_i32, %c0_i32_0 : i32, i32
  }
  func.func @transform_3(%arg0: i32) -> (i32, i32) {
    %c0_i32 = arith.constant 0 : i32
    %c0_i32_0 = arith.constant 0 : i32
    %c0_i32_1 = arith.constant 0 : i32
    return %c0_i32, %c0_i32_0 : i32, i32
  }
  func.func @transform_4(%arg0: i32) -> (i32, i32) {
    %c0_i32 = arith.constant 0 : i32
    %c0_i32_0 = arith.constant 0 : i32
    %c0_i32_1 = arith.constant 0 : i32
    return %c0_i32, %c0_i32_0 : i32, i32
  }
  func.func @transform_5(%arg0: i32) -> (i32, i32) {
    %c0_i32 = arith.constant 0 : i32
    %c0_i32_0 = arith.constant 0 : i32
    return %arg0, %c0_i32 : i32, i32
  }
}

</mosaic_0001>

<bundles_post_ra>
// kernel: neural_network_forward.1
= control target key start
LH: loop header
LB: loop body
LE: loop exit
PB: predicated region body
PF: predicated region fallthrough
CT: control target
= control target key end

     0   :  { %vm636_vm0 = vcmask 130048   ;;  %s1750_s0 = inlined_call_operand.vmem [shape: f32[8,784], index: 0, kind: input, shape index: {}]   ;;  %s1751_s1 = inlined_call_operand.vmem [shape: bf16[784,256], index: 1, kind: input, shape index: {}]   ;;  %s1752_s2 = inlined_call_operand.vmem [shape: f32[1,256], index: 2, kind: input, shape index: {}]   ;;  %s1753_s3 = inlined_call_operand.vmem [shape: bf16[256,128], index: 3, kind: input, shape index: {}]   ;;  %s1754_s4 = inlined_call_operand.vmem [shape: f32[1,128], index: 4, kind: input, shape index: {}]   ;;  %s1755_s5 = inlined_call_operand.hbm [shape: f32[8,10], index: 5, kind: output, shape index: {}]  }
   0x1   :  { %v1160_v0 = vld [vmem:[%s1751_s1 + $0x74] ss:$8 sps:$4 sm:$0xff]   ;;  %v1162_v1 = vld [vmem:[%s1751_s1 + $0x70] ss:$8 sps:$4 sm:$0xff]   ;;  %v1166_v4 = vld [vmem:[%s1751_s1 + $0x64] ss:$8 sps:$4 sm:$0xff]  }
   0x2   :  { %640 = vmatprep.subr.bf16.mxu0 %v1160_v0  ;;  %v1163_v2 = vld [vmem:[%s1751_s1 + $0x174] ss:$8 sps:$4 sm:$0xff]   ;;  %v1165_v3 = vld [vmem:[%s1751_s1 + $0x170] ss:$8 sps:$4 sm:$0xff]   ;;  %v1168_v5 = vld [vmem:[%s1751_s1 + $0x60] ss:$8 sps:$4 sm:$0xff]  }
   0x3   :  { %641 = vmatpush1.bf16.msra.mxu0 %v1162_v1  ;;  %681 = vmatprep.subr.bf16.mxu1 %v1163_v2  ;;  %v1169_v6 = vld [vmem:[%s1751_s1 + $0x164] ss:$8 sps:$4 sm:$0xff]   ;;  %v1171_v7 = vld [vmem:[%s1751_s1 + $0x160] ss:$8 sps:$4 sm:$0xff]   ;;  %v1172_v8 = vld [vmem:[%s1751_s1 + $0x54] ss:$8 sps:$4 sm:$0xff]  }
   0x4   :  { %682 = vmatpush1.bf16.msra.mxu1 %v1165_v3  ;;  %642 = vmatprep.subr.bf16.mxu0 %v1166_v4  ;;  %v1174_v9 = vld [vmem:[%s1751_s1 + $0x50] ss:$8 sps:$4 sm:$0xff]   ;;  %v1175_v10 = vld [vmem:[%s1751_s1 + $0x154] ss:$8 sps:$4 sm:$0xff]   ;;  %v1178_v11 = vld [vmem:[%s1751_s1 + $0x44] ss:$8 sps:$4 sm:$0xff]  }
   0x5   :  { %683 = vmatprep.subr.bf16.mxu1 %v1169_v6  ;;  %v1177_v12 = vld [vmem:[%s1751_s1 + $0x150] ss:$8 sps:$4 sm:$0xff]   ;;  %v1181_v13 = vld [vmem:[%s1751_s1 + $0x144] ss:$8 sps:$4 sm:$0xff]   ;;  %v1180_v14 = vld [vmem:[%s1751_s1 + $0x40] ss:$8 sps:$4 sm:$0xff]  }
   0x6   :  { %v1184_v15 = vld [vmem:[%s1751_s1 + $0x34] ss:$8 sps:$4 sm:$0xff]   ;;  %v1183_v16 = vld [vmem:[%s1751_s1 + $0x140] ss:$8 sps:$4 sm:$0xff]   ;;  %v1186_v18 = vld [vmem:[%s1751_s1 + $0x30] ss:$8 sps:$4 sm:$0xff]  }
   0x7   :  { %643 = vmatpush1.bf16.msra.mxu0 %v1168_v5  ;;  %v1187_v17 = vld [vmem:[%s1751_s1 + $0x134] ss:$8 sps:$4 sm:$0xff]   ;;  %v1190_v19 = vld [vmem:[%s1751_s1 + $0x24] ss:$8 sps:$4 sm:$0xff]   ;;  %v1189_v20 = vld [vmem:[%s1751_s1 + $0x130] ss:$8 sps:$4 sm:$0xff]  }
   0x8   :  { %644 = vmatprep.subr.bf16.mxu0 %v1172_v8  ;;  %684 = vmatpush1.bf16.msra.mxu1 %v1171_v7  ;;  %v1193_v21 = vld [vmem:[%s1751_s1 + $0x124] ss:$8 sps:$4 sm:$0xff]   ;;  %v1192_v22 = vld [vmem:[%s1751_s1 + $0x20] ss:$8 sps:$4 sm:$0xff]   ;;  %v1196_v23 = vld [vmem:[%s1751_s1 + $0x14] ss:$8 sps:$4 sm:$0xff]  }
   0x9   :  { %685 = vmatprep.subr.bf16.mxu1 %v1175_v10  ;;  %v1195_v24 = vld [vmem:[%s1751_s1 + $0x120] ss:$8 sps:$4 sm:$0xff]   ;;  %v1199_v25 = vld [vmem:[%s1751_s1 + $0x114] ss:$8 sps:$4 sm:$0xff]   ;;  %v1198_v26 = vld [vmem:[%s1751_s1 + $0x10] ss:$8 sps:$4 sm:$0xff]  }
   0xa   :  { %v1202_v27 = vld [vmem:[%s1751_s1 + $0x4] ss:$8 sps:$4 sm:$0xff]   ;;  %v1201_v28 = vld [vmem:[%s1751_s1 + $0x110] ss:$8 sps:$4 sm:$0xff]   ;;  %v1204_v30 = vld [vmem:[%s1751_s1] ss:$8 sps:$4 sm:$0xff]  }
   0xb   :  { %645 = vmatpush1.bf16.msra.mxu0 %v1174_v9  ;;  %v1205_v29 = vld [vmem:[%s1751_s1 + $0x104] ss:$8 sps:$4 sm:$0xff]   ;;  %v1208_v31 = vld [vmem:[%s1751_s1 + $0xf4] ss:$8 sps:$4 sm:$0xff]   ;;  %v1207_v32 = vld [vmem:[%s1751_s1 + $0x100] ss:$8 sps:$4 sm:$0xff]  }
   0xc   :  { %646 = vmatprep.subr.bf16.mxu0 %v1178_v11  ;;  %686 = vmatpush1.bf16.msra.mxu1 %v1177_v12  ;;  %v1211_v33 = vld [vmem:[%s1751_s1 + $0x1f4] ss:$8 sps:$4 sm:$0xff]   ;;  %v1210_v34 = vld [vmem:[%s1751_s1 + $0xf0] ss:$8 sps:$4 sm:$0xff]   ;;  %v1214_v35 = vld [vmem:[%s1751_s1 + $0xe4] ss:$8 sps:$4 sm:$0xff]  }
   0xd   :  { %687 = vmatprep.subr.bf16.mxu1 %v1181_v13  ;;  %v1213_v36 = vld [vmem:[%s1751_s1 + $0x1f0] ss:$8 sps:$4 sm:$0xff]   ;;  %v1217_v37 = vld [vmem:[%s1751_s1 + $0x1e4] ss:$8 sps:$4 sm:$0xff]   ;;  %v1216_v38 = vld [vmem:[%s1751_s1 + $0xe0] ss:$8 sps:$4 sm:$0xff]  }
   0xe   :  { %v1220_v39 = vld [vmem:[%s1751_s1 + $0xd4] ss:$8 sps:$4 sm:$0xff]   ;;  %v1219_v40 = vld [vmem:[%s1751_s1 + $0x1e0] ss:$8 sps:$4 sm:$0xff]   ;;  %v1222_v42 = vld [vmem:[%s1751_s1 + $0xd0] ss:$8 sps:$4 sm:$0xff]  }
   0xf   :  { %647 = vmatpush1.bf16.msra.mxu0 %v1180_v14  ;;  %v1223_v41 = vld [vmem:[%s1751_s1 + $0x1d4] ss:$8 sps:$4 sm:$0xff]   ;;  %v1226_v43 = vld [vmem:[%s1751_s1 + $0xc4] ss:$8 sps:$4 sm:$0xff]   ;;  %v1225_v44 = vld [vmem:[%s1751_s1 + $0x1d0] ss:$8 sps:$4 sm:$0xff]  }
  0x10   :  { %648 = vmatprep.subr.bf16.mxu0 %v1184_v15  ;;  %688 = vmatpush1.bf16.msra.mxu1 %v1183_v16  ;;  %v1229_v45 = vld [vmem:[%s1751_s1 + $0x1c4] ss:$8 sps:$4 sm:$0xff]   ;;  %v1228_v47 = vld [vmem:[%s1751_s1 + $0xc0] ss:$8 sps:$4 sm:$0xff]   ;;  %v1232_v49 = vld [vmem:[%s1751_s1 + $0xb4] ss:$8 sps:$4 sm:$0xff]  }
  0x11   :  { %689 = vmatprep.subr.bf16.mxu1 %v1187_v17  ;;  %v23_v46 = vld [vmem:[%s1750_s0 + $0x8] sm:$0xff]  ;;  %v25_v50 = vld [vmem:[%s1750_s0 + $0x18] sm:$0xff]  ;;  %v22_v4 = vld [vmem:[%s1750_s0] sm:$0xff] }
  0x12   :  { %v30_v48 = vpack.c.bf16 %v23_v46, %v23_v46  ;;  %v1231_v51 = vld [vmem:[%s1751_s1 + $0x1c0] ss:$8 sps:$4 sm:$0xff]   ;;  %v32_v52 = vpack.c.bf16 %v25_v50, %v25_v50  ;;  %v1235_v53 = vld [vmem:[%s1751_s1 + $0x1b4] ss:$8 sps:$4 sm:$0xff]   ;;  %v1234_v54 = vld [vmem:[%s1751_s1 + $0xb0] ss:$8 sps:$4 sm:$0xff]   ;;  %v29_v7 = vpack.c.bf16 %v22_v4, %v22_v4 }
  0x13   :  { %649 = vmatpush1.bf16.msra.mxu0 %v1186_v18  ;;  %v1238_v55 = vld [vmem:[%s1751_s1 + $0xa4] ss:$8 sps:$4 sm:$0xff]   ;;  %v1237_v56 = vld [vmem:[%s1751_s1 + $0x1b0] ss:$8 sps:$4 sm:$0xff]   ;;  %v1240_v58 = vld [vmem:[%s1751_s1 + $0xa0] ss:$8 sps:$4 sm:$0xff]  }
  0x14   :  { %650 = vmatprep.subr.bf16.mxu0 %v1190_v19  ;;  %690 = vmatpush1.bf16.msra.mxu1 %v1189_v20  ;;  %v1241_v57 = vld [vmem:[%s1751_s1 + $0x1a4] ss:$8 sps:$4 sm:$0xff]   ;;  %v1244_v59 = vld [vmem:[%s1751_s1 + $0x94] ss:$8 sps:$4 sm:$0xff]   ;;  %v1243_v60 = vld [vmem:[%s1751_s1 + $0x1a0] ss:$8 sps:$4 sm:$0xff]  }
  0x15   :  { %691 = vmatprep.subr.bf16.mxu1 %v1193_v21  ;;  %672 = vmatprep.mubr.bf16.mxu0 %v30_v48  ;;  %v1247_v61 = vld [vmem:[%s1751_s1 + $0x194] ss:$8 sps:$4 sm:$0xff]   ;;  %v1246_v62 = vld [vmem:[%s1751_s1 + $0x90] ss:$8 sps:$4 sm:$0xff]   ;;  %v1250_v63 = vld [vmem:[%s1751_s1 + $0x84] ss:$8 sps:$4 sm:$0xff]  }
  0x16   :  { %713 = vmatprep.mubr.bf16.mxu1 %v32_v52  ;;  %v1249_v0 = vld [vmem:[%s1751_s1 + $0x190] ss:$8 sps:$4 sm:$0xff]   ;;  %v1252_v1 = vld [vmem:[%s1751_s1 + $0x80] ss:$8 sps:$4 sm:$0xff]   ;;  %v1253_v2 = vld [vmem:[%s1751_s1 + $0x184] ss:$8 sps:$4 sm:$0xff]  }
  0x17   :  { %651 = vmatpush1.bf16.msra.mxu0 %v1192_v22  ;;  %v1255_v3 = vld [vmem:[%s1751_s1 + $0x180] ss:$8 sps:$4 sm:$0xff]   ;;  %v1258_v5 = vld [vmem:[%s1751_s1 + $0x274] ss:$8 sps:$4 sm:$0xff]   ;;  %v1256_v8 = vld [vmem:[%s1751_s1 + $0x270] ss:$8 sps:$4 sm:$0xff]  }
  0x18   :  { %652 = vmatprep.subr.bf16.mxu0 %v1196_v23  ;;  %692 = vmatpush1.bf16.msra.mxu1 %v1195_v24  ;;  %v24_v6 = vld [vmem:[%s1750_s0 + $0x10] sm:$0xff]  ;;  %v1261_v9 = vld [vmem:[%s1751_s1 + $0x264] ss:$8 sps:$4 sm:$0xff]   ;;  %v1301_v11 = vld [vmem:[%s1751_s1 + $0x300] ss:$8 sps:$4 sm:$0xff]   ;;  %v1345_v19 = vmov 0  }
  0x19   :  { %693 = vmatprep.subr.bf16.mxu1 %v1199_v25  ;;  %v31_v10 = vpack.c.bf16 %v24_v6, %v24_v6  ;;  %v1303_v12 = vld [vmem:[%s1751_s1 + $0x304] ss:$8 sps:$4 sm:$0xff]   ;;  %v1259_v13 = vld [vmem:[%s1751_s1 + $0x260] ss:$8 sps:$4 sm:$0xff]   ;;  %v1264_v14 = vld [vmem:[%s1751_s1 + $0x254] ss:$8 sps:$4 sm:$0xff]  }
  0x1a   :  { %v28_v15 = vld [vmem:[%s1750_s0 + $0x30] sm:$0xff]  ;;  %v27_v16 = vld [vmem:[%s1750_s0 + $0x28] sm:$0xff] }
  0x1b   :  { %653 = vmatpush1.bf16.msra.mxu0 %v1198_v26  ;;  %v34_v17 = vpack.c.bf16 %v27_v16, %v27_v16  ;;  %v1262_v18 = vld [vmem:[%s1751_s1 + $0x250] ss:$8 sps:$4 sm:$0xff]   ;;  %v1267_v20 = vld [vmem:[%s1751_s1 + $0x244] ss:$8 sps:$4 sm:$0xff]   ;;  %v35_v21 = vpack.c.bf16 %v28_v15, %v28_v15  ;;  %v1265_v22 = vld [vmem:[%s1751_s1 + $0x240] ss:$8 sps:$4 sm:$0xff]  }
  0x1c   :  { %654 = vmatprep.subr.bf16.mxu0 %v1202_v27  ;;  %694 = vmatpush1.bf16.msra.mxu1 %v1201_v28  ;;  %v1270_v23 = vld [vmem:[%s1751_s1 + $0x234] ss:$8 sps:$4 sm:$0xff]  }
  0x1d   :  { %695 = vmatprep.subr.bf16.mxu1 %v1205_v29 }
  0x1f   :  { %655 = vmatpush1.bf16.msra.mxu0 %v1204_v30 }
  0x20   :  { %656 = vmatprep.subr.bf16.mxu0 %v1208_v31  ;;  %696 = vmatpush1.bf16.msra.mxu1 %v1207_v32 }
  0x21   :  { %697 = vmatprep.subr.bf16.mxu1 %v1211_v33 }
  0x23   :  { %657 = vmatpush2.bf16.msra.mxu0 %v1210_v34 }
  0x24   :  { %658 = vmatprep.subr.bf16.mxu0 %v1214_v35  ;;  %698 = vmatpush2.bf16.msra.mxu1 %v1213_v36 }
  0x25   :  { %699 = vmatprep.subr.bf16.mxu1 %v1217_v37 }
  0x27   :  { %659 = vmatpush2.bf16.msra.mxu0 %v1216_v38 }
  0x28   :  { %660 = vmatprep.subr.bf16.mxu0 %v1220_v39  ;;  %700 = vmatpush2.bf16.msra.mxu1 %v1219_v40 }
  0x29   :  { %701 = vmatprep.subr.bf16.mxu1 %v1223_v41 }
  0x2b   :  { %661 = vmatpush2.bf16.msra.mxu0 %v1222_v42 }
  0x2c   :  { %662 = vmatprep.subr.bf16.mxu0 %v1226_v43  ;;  %702 = vmatpush2.bf16.msra.mxu1 %v1225_v44 }
  0x2d   :  { %703 = vmatprep.subr.bf16.mxu1 %v1229_v45 }
  0x2f   :  { %663 = vmatpush2.bf16.msra.mxu0 %v1228_v47 }
  0x30   :  { %664 = vmatprep.subr.bf16.mxu0 %v1232_v49  ;;  %704 = vmatpush2.bf16.msra.mxu1 %v1231_v51 }
  0x31   :  { %705 = vmatprep.subr.bf16.mxu1 %v1235_v53 }
  0x33   :  { %665 = vmatpush2.bf16.msra.mxu0 %v1234_v54 }
  0x34   :  { %666 = vmatprep.subr.bf16.mxu0 %v1238_v55  ;;  %706 = vmatpush2.bf16.msra.mxu1 %v1237_v56 }
  0x35   :  { %707 = vmatprep.subr.bf16.mxu1 %v1241_v57 }
  0x37   :  { %667 = vmatpush2.bf16.msra.mxu0 %v1240_v58 }
  0x38   :  { %668 = vmatprep.subr.bf16.mxu0 %v1244_v59  ;;  %708 = vmatpush2.bf16.msra.mxu1 %v1243_v60 }
  0x39   :  { %709 = vmatprep.subr.bf16.mxu1 %v1247_v61 }
  0x3b   :  { %669 = vmatpush2.bf16.msra.mxu0 %v1246_v62 }
  0x3c   :  { %670 = vmatprep.subr.bf16.mxu0 %v1250_v63  ;;  %710 = vmatpush2.bf16.msra.mxu1 %v1249_v0 }
  0x3d   :  { %711 = vmatprep.subr.bf16.mxu1 %v1253_v2 }
  0x3f   :  { %671 = vmatpush2.bf16.msra.mxu0 %v1252_v1 }
  0x40   :  { %722 = vmatprep.subr.bf16.mxu0 %v1258_v5  ;;  %712 = vmatpush2.bf16.msra.mxu1 %v1255_v3 }
  0x41   :  { %777 = vmatprep.subr.bf16.mxu1 %v1303_v12 }
  0x42   :  { %673 = vmatmul.mubr.bf16.vlgmr.msra.gmra.mxu0 %v29_v7 }
  0x43   :  { %723 = vmatpush1.bf16.msra.mxu0 %v1256_v8  ;;  %714 = vmatmul.mubr.bf16.vlgmr.msra.gmra.mxu1 %v31_v10 }
  0x44   :  { %724 = vmatprep.subr.bf16.mxu0 %v1261_v9  ;;  %778 = vmatpush1.bf16.msra.mxu1 %v1301_v11 }
  0x45   :  { %795 = vmatprep.mubr.bf16.mxu1 %v1345_v19  ;;  %754 = vmatprep.mubr.bf16.mxu0 %v34_v17 }
  0x47   :  { %725 = vmatpush1.bf16.msra.mxu0 %v1259_v13 }
  0x48   :  { %726 = vmatprep.subr.bf16.mxu0 %v1264_v14 }
  0x4b   :  { %727 = vmatpush1.bf16.msra.mxu0 %v1262_v18  ;;  %1112 = vmatmul.mubr.msk.bf16.vlgmr.msra.gmra.mxu1 %vm636_vm0, %v35_v21 }
  0x4c   :  { %728 = vmatprep.subr.bf16.mxu0 %v1267_v20 }
  0x4d   :  { %10 = vsyncpa [#allocation4], 0  ;;  %v1268_v24 = vld [vmem:[%s1751_s1 + $0x230] ss:$8 sps:$4 sm:$0xff]   ;;  %v1273_v25 = vld [vmem:[%s1751_s1 + $0x224] ss:$8 sps:$4 sm:$0xff]   ;;  %v136_v13 = vlaneseq }
  0x4e   :  { %v1271_v26 = vld [vmem:[%s1751_s1 + $0x220] ss:$8 sps:$4 sm:$0xff]   ;;  %v1276_v27 = vld [vmem:[%s1751_s1 + $0x214] ss:$8 sps:$4 sm:$0xff]   ;;  %v1274_v28 = vld [vmem:[%s1751_s1 + $0x210] ss:$8 sps:$4 sm:$0xff]  }
  0x4f   :  { %729 = vmatpush1.bf16.msra.mxu0 %v1265_v22  ;;  %v1279_v29 = vld [vmem:[%s1751_s1 + $0x204] ss:$8 sps:$4 sm:$0xff]   ;;  %v1277_v30 = vld [vmem:[%s1751_s1 + $0x200] ss:$8 sps:$4 sm:$0xff]   ;;  %v1282_v31 = vld [vmem:[%s1751_s1 + $0x2f4] ss:$8 sps:$4 sm:$0xff]  }
  0x50   :  { %730 = vmatprep.subr.bf16.mxu0 %v1270_v23  ;;  %v1280_v32 = vld [vmem:[%s1751_s1 + $0x2f0] ss:$8 sps:$4 sm:$0xff]   ;;  %v1285_v33 = vld [vmem:[%s1751_s1 + $0x2e4] ss:$8 sps:$4 sm:$0xff]   ;;  %v1283_v34 = vld [vmem:[%s1751_s1 + $0x2e0] ss:$8 sps:$4 sm:$0xff]  }
  0x51   :  { %v1288_v35 = vld [vmem:[%s1751_s1 + $0x2d4] ss:$8 sps:$4 sm:$0xff]   ;;  %v1286_v36 = vld [vmem:[%s1751_s1 + $0x2d0] ss:$8 sps:$4 sm:$0xff]   ;;  %v1291_v37 = vld [vmem:[%s1751_s1 + $0x2c4] ss:$8 sps:$4 sm:$0xff]  }
  0x52   :  { %v1289_v38 = vld [vmem:[%s1751_s1 + $0x2c0] ss:$8 sps:$4 sm:$0xff]   ;;  %v1294_v39 = vld [vmem:[%s1751_s1 + $0x2b4] ss:$8 sps:$4 sm:$0xff]   ;;  %v1292_v40 = vld [vmem:[%s1751_s1 + $0x2b0] ss:$8 sps:$4 sm:$0xff]  }
  0x53   :  { %731 = vmatpush1.bf16.msra.mxu0 %v1268_v24  ;;  %v1297_v41 = vld [vmem:[%s1751_s1 + $0x2a4] ss:$8 sps:$4 sm:$0xff]   ;;  %v1295_v42 = vld [vmem:[%s1751_s1 + $0x2a0] ss:$8 sps:$4 sm:$0xff]   ;;  %v1300_v43 = vld [vmem:[%s1751_s1 + $0x294] ss:$8 sps:$4 sm:$0xff]  }
  0x54   :  { %732 = vmatprep.subr.bf16.mxu0 %v1273_v25  ;;  %v1298_v44 = vld [vmem:[%s1751_s1 + $0x290] ss:$8 sps:$4 sm:$0xff]   ;;  %v1306_v45 = vld [vmem:[%s1751_s1 + $0x284] ss:$8 sps:$4 sm:$0xff]   ;;  %v1304_v46 = vld [vmem:[%s1751_s1 + $0x280] ss:$8 sps:$4 sm:$0xff]  }
  0x55   :  { %v26_v47 = vld [vmem:[%s1750_s0 + $0x20] sm:$0xff]  ;;  %v1307_v49 = vld [vmem:[%s1753_s3 + $0x78] sm:$0xff]   ;;  %v1309_v51 = vld [vmem:[%s1753_s3 + $0x70] sm:$0xff]   ;;  %v137_v14 = vshrl.u32 %v136_v13, 7  ;;  %s1346_s0 = smov [#allocation3]   ;;  %vm998_vm1 = vcmask 80896  }
  0x56   :  { %v33_v48 = vpack.c.bf16 %v26_v47, %v26_v47  ;;  %v1308_v50 = vld [vmem:[%s1753_s3 + $0x38] sm:$0xff]   ;;  %1136 = vmatprep.subr.bf16.mxu1 %v1307_v49  ;;  %v1310_v52 = vld [vmem:[%s1753_s3 + $0x30] sm:$0xff]   ;;  %v1311_v53 = vld [vmem:[%s1753_s3 + $0x68] sm:$0xff]   ;;  %s1006_s9 = sshll.u32 %s1346_s0, 4  ;;  %s1007_s9 = int_to_ptr.vmem [resolvable:$true] %s1006_s9 }
  0x57   :  { %733 = vmatpush1.bf16.msra.mxu0 %v1271_v26  ;;  %1137 = vmatpush3.bf16.msra.mxu1 %v1308_v50  ;;  %v1312_v54 = vld [vmem:[%s1753_s3 + $0x28] sm:$0xff]   ;;  %v1313_v55 = vld [vmem:[%s1753_s3 + $0x60] sm:$0xff]   ;;  %v1315_v57 = vld [vmem:[%s1753_s3 + $0x58] sm:$0xff]   ;;  %v138_v15 = vsub.s32 0, %v137_v14  ;;  %v142_v17 = vsub.s32 1, %v137_v14  ;;  %s1323_s10 = scalar_lea.vmem %s1007_s9, 128  ;;  %p1328_p1 = scmp.lt.s32.totalorder %s1007_s9, %s1007_s9 }
  0x58   :  { %734 = vmatprep.subr.bf16.mxu0 %v1276_v27  ;;  %1138 = vmatprep.subr.bf16.mxu1 %v1309_v51  ;;  %v1314_v56 = vld [vmem:[%s1753_s3 + $0x20] sm:$0xff]   ;;  %v1316_v58 = vld [vmem:[%s1753_s3 + $0x18] sm:$0xff]   ;;  %v1317_v59 = vld [vmem:[%s1753_s3 + $0x50] sm:$0xff]   ;;  %p1324_p0 = scmp.ne.s32.totalorder %s1007_s9, %s1323_s10  ;;  %p1329_p2 = scmp.lt.s32.totalorder %s1323_s10, %s1323_s10 }
  0x59   :  { %v1318_v60 = vld [vmem:[%s1753_s3 + $0x10] sm:$0xff]   ;;  %v1319_v61 = vld [vmem:[%s1753_s3 + $0x48] sm:$0xff]   ;;  %v1321_v63 = vld [vmem:[%s1753_s3 + $0x40] sm:$0xff]  }
  0x5a   :  { %v1320_v62 = vld [vmem:[%s1753_s3 + $0x8] sm:$0xff]   ;;  %v1322_v0 = vld [vmem:[%s1753_s3] sm:$0xff]   ;;  %p1330_p3 = por %p1329_p2, %p1328_p1 }
  0x5b   :  { %735 = vmatpush1.bf16.msra.mxu0 %v1274_v28  ;;  %1139 = vmatpush3.bf16.msra.mxu1 %v1310_v52  ;;  %v134_v16 = vld [vmem:[%s1752_s2] sm:$0x3] }
  0x5c   :  { %736 = vmatprep.subr.bf16.mxu0 %v1279_v29  ;;  %1140 = vmatprep.subr.bf16.mxu1 %v1311_v53  ;;  %v139_v18 = vrot.slane %v134_v16, %v138_v15  ;;  %v143_v19 = vrot.slane %v134_v16, %v142_v17  ;;  %p1331_p4 = pnand %p1330_p3, %p1324_p0 }
  0x5f   :  { %737 = vmatpush1.bf16.msra.mxu0 %v1277_v30  ;;  %1141 = vmatpush3.bf16.msra.mxu1 %v1312_v54 }
  0x60   :  { %738 = vmatprep.subr.bf16.mxu0 %v1282_v31  ;;  %1142 = vmatprep.subr.bf16.mxu1 %v1313_v55 }
  0x63   :  { %739 = vmatpush2.bf16.msra.mxu0 %v1280_v32  ;;  %1143 = vmatpush3.bf16.msra.mxu1 %v1314_v56 }
  0x64   :  { %740 = vmatprep.subr.bf16.mxu0 %v1285_v33  ;;  %1144 = vmatprep.subr.bf16.mxu1 %v1315_v57 }
  0x67   :  { %741 = vmatpush2.bf16.msra.mxu0 %v1283_v34  ;;  %1145 = vmatpush3.bf16.msra.mxu1 %v1316_v58 }
  0x68   :  { %742 = vmatprep.subr.bf16.mxu0 %v1288_v35  ;;  %1146 = vmatprep.subr.bf16.mxu1 %v1317_v59 }
  0x6b   :  { %743 = vmatpush2.bf16.msra.mxu0 %v1286_v36  ;;  %1147 = vmatpush3.bf16.msra.mxu1 %v1318_v60 }
  0x6c   :  { %744 = vmatprep.subr.bf16.mxu0 %v1291_v37  ;;  %1148 = vmatprep.subr.bf16.mxu1 %v1319_v61  ;;  %v1114_v37 = vld [vmem:[%s1754_s4] ss:$0 sm:$0xff] }
  0x6f   :  { %745 = vmatpush2.bf16.msra.mxu0 %v1289_v38  ;;  %1149 = vmatpush3.bf16.msra.mxu1 %v1320_v62 }
  0x70   :  { %746 = vmatprep.subr.bf16.mxu0 %v1294_v39  ;;  %1150 = vmatprep.subr.bf16.mxu1 %v1321_v63 }
  0x73   :  { %747 = vmatpush2.bf16.msra.mxu0 %v1292_v40  ;;  %1151 = vmatpush3.bf16.msra.mxu1 %v1322_v0 }
  0x74   :  { %748 = vmatprep.subr.bf16.mxu0 %v1297_v41 }
  0x77   :  { %749 = vmatpush2.bf16.msra.mxu0 %v1295_v42 }
  0x78   :  { %750 = vmatprep.subr.bf16.mxu0 %v1300_v43 }
  0x7b   :  { %751 = vmatpush2.bf16.msra.mxu0 %v1298_v44 }
  0x7c   :  { %752 = vmatprep.subr.bf16.mxu0 %v1306_v45 }
  0x7f   :  { %753 = vmatpush2.bf16.msra.mxu0 %v1304_v46 }
  0x82   :  { %755 = vmatmul.mubr.bf16.vlgmr.msra.gmra.mxu0 %v33_v48 }
 0x102   :  { %v674_v1 = vpop.f32.mrf.mxu0 }
 0x103   :  { %v715_v3 = vpop.f32.mrf.mxu1  ;;  %v675_v20 = vadd.f32 %v674_v1, %v139_v18 }
 0x104   :  { %v676_v2 = vpop.f32.mrf.mxu0 }
 0x105   :  { %v717_v5 = vpop.f32.mrf.mxu1  ;;  %v677_v21 = vadd.f32 %v676_v2, %v143_v19  ;;  %v716_v22 = vadd.f32 %v715_v3, %v675_v20 }
 0x106   :  { %v678_v4 = vpop.f32.mrf.mxu0 }
 0x107   :  { %v719_v7 = vpop.f32.mrf.mxu1  ;;  %v718_v24 = vadd.f32 %v717_v5, %v677_v21 }
 0x108   :  { %v679_v6 = vpop.f32.mrf.mxu0 }
 0x109   :  { %v720_v8 = vpop.f32.mrf.mxu1 }
 0x10b   :  { %v797_v9 = vpop.f32.mrf.mxu1 }
 0x10d   :  { %v799_v10 = vpop.f32.mrf.mxu1 }
 0x10f   :  { %v801_v11 = vpop.f32.mrf.mxu1 }
 0x111   :  { %v802_v12 = vpop.f32.mrf.mxu1 }
 0x142   :  { %v756_v23 = vpop.f32.mrf.mxu0 }
 0x143   :  { %v757_v25 = vadd.f32 %v756_v23, %v716_v22 }
 0x144   :  { %v758_v26 = vpop.f32.mrf.mxu0 }
 0x145   :  { %v798_v27 = vadd.f32 %v797_v9, %v757_v25  ;;  %v759_v28 = vadd.f32 %v758_v26, %v718_v24 }
 0x146   :  { %v760_v29 = vpop.f32.mrf.mxu0 }
 0x147   :  { %v800_v30 = vadd.f32 %v799_v10, %v759_v28  ;;  %v804_v31 = vmax.f32 %v798_v27, 0.0 }
 0x148   :  { %v761_v32 = vpop.f32.mrf.mxu0 }
 0x149   :  { %v805_v33 = vmax.f32 %v800_v30, 0.0  ;;  %v1134_v35 = vpack.c.bf16 %v804_v31, %v804_v31 }
 0x14b   :  { %v1135_v34 = vpack.c.bf16 %v805_v33, %v805_v33 }
 0x14d   :  { %990 = vmatprep.mubr.bf16.mxu1 %v1135_v34 }
 0x14e   :  { %991 = vmatmul.mubr.bf16.vlgmr.msra.gmra.mxu1 %v1134_v35 }
 0x20e   :  { %v1152_v36 = vpop.f32.mrf.mxu1 }
 0x210   :  { %v1153_v38 = vpop.f32.mrf.mxu1 }
 0x211   :  { %v1154_v39 = vadd.f32 %v1153_v38, %v1152_v36 }
 0x212   :  { %v1155_v40 = vpop.f32.mrf.mxu1 }
 0x213   :  { %v993_v41 = vadd.f32 %v1154_v39, %v1114_v37 }
 0x214   :  { %v1156_v42 = vpop.f32.mrf.mxu1 }
 0x215   :  { %999 = vst.msk [vmem:[#allocation3] sm:$0xff] %vm998_vm1, %v993_v41 }
 0x216   :  { %1334 = shalt.err (!%p1331_p4)
}
 0x217   :  { %1009 = dma.vmem_to_hbm [thread:$0]  %s1007_s9, 128, %s1755_s5, [#allocation4]  }
 0x218   :  { %1343 = dma.done.wait [#allocation4], 128  }
 0x219   :  { %1344 = vsyncadd [#allocation4], 4294967168 }
 0x21a   :  { %1013 = vsyncpa [#allocation4], 1 }

</bundles_post_ra>
